<compile_context>
chip_gen: v7x
topology: tpu7x:2x2x1
jax: 0.10.0
libtpu: 0.0.40
codegen_flags: <defaults>
</compile_context>

<pallas_src>
import functools
import math

import jax
import jax.numpy as jnp
from jax import lax
from jax.experimental import pallas as pl
from jax.experimental.pallas import tpu as pltpu


def _cdiv(a, b):
    return -(-a // b)


def _round_up(a, m):
    return _cdiv(a, m) * m


def _round_down(a, m):
    return (a // m) * m


def channel_attention_kernel(x_ref, w1_ref, w2_ref, o_ref, sum_acc, max_acc, *,
                             inv_hw, hw_len, hw_tile, need_mask, b_tile):
    # x_ref  : (b_tile, C, hw_tile) spatial tile, native dtype
    # w1_ref : (hidden, C)   conv1 1x1 weight, original PyTorch (out, in) layout
    # w2_ref : (C, hidden)   conv2 1x1 weight, original PyTorch (out, in) layout
    # o_ref  : (b_tile, C)   sigmoid(channel attention)
    # sum_acc: (b_tile, C) f32 running spatial sum
    # max_acc: (b_tile, C) native-dtype running spatial max
    s = pl.program_id(1)
    n_s = pl.num_programs(1)

    @pl.when(s == 0)
    def _init():
        sum_acc[...] = jnp.zeros(sum_acc.shape, sum_acc.dtype)
        max_acc[...] = jnp.full(max_acc.shape, -jnp.inf, max_acc.dtype)

    x = x_ref[...]                                           # native dtype tile
    # Sum: f32 accumulation without materializing an f32 copy that also feeds max.
    sum_acc[...] = sum_acc[...] + jnp.sum(x, axis=-1, dtype=jnp.float32)

    # Max: exact in the native dtype.  When HW was zero-padded, only the final
    # spatial step can contain pad columns, so the mask cost is gated to it.
    if need_mask:
        @pl.when(s < n_s - 1)
        def _max_body():
            max_acc[...] = jnp.maximum(max_acc[...], jnp.max(x, axis=-1))

        @pl.when(s == n_s - 1)
        def _max_tail():
            col = lax.broadcasted_iota(jnp.int32, (1, 1, hw_tile), 2) + s * hw_tile
            xm = jnp.where(col < hw_len, x, float("-inf"))
            max_acc[...] = jnp.maximum(max_acc[...], jnp.max(xm, axis=-1))
    else:
        max_acc[...] = jnp.maximum(max_acc[...], jnp.max(x, axis=-1))

    @pl.when(s == n_s - 1)
    def _finalize():
        avg = sum_acc[...] * inv_hw                          # (b_tile, C)
        mx = max_acc[...].astype(jnp.float32)                # (b_tile, C)
        pooled = jnp.concatenate([avg, mx], axis=0)          # (2*b_tile, C)

        w1 = w1_ref[...].astype(jnp.float32)                 # (hidden, C)
        w2 = w2_ref[...].astype(jnp.float32)                 # (C, hidden)

        # One fused matmul pair covering both the avg and max branches.
        # Contract on dim 1 of both operands (pooled @ w1.T) so the weights keep
        # their original PyTorch layout -> no transposes anywhere.
        h = lax.dot_general(pooled, w1, (((1,), (1,)), ((), ())),
                            preferred_element_type=jnp.float32)    # (2*b_tile, hidden)
        h = jnp.maximum(h, 0.0)                                    # ReLU
        out = lax.dot_general(h, w2, (((1,), (1,)), ((), ())),
                              preferred_element_type=jnp.float32)  # (2*b_tile, C)

        att = out[:b_tile, :] + out[b_tile:, :]              # avg branch + max branch
        o_ref[...] = jax.nn.sigmoid(att).astype(o_ref.dtype)


# Per-pipeline-buffer budget for the x tile (double-buffered by default), chosen so
# total VMEM stays ~<= 32 MiB on every generation (v7x physical VMEM is 64 MiB).
_X_BUF_BYTES = 12 * 1024 * 1024
_MAX_HW_TILE = 8192     # diminishing HBM-roofline returns beyond this
_MIN_HW_TILE = 512      # keep per-(b,c)-row DMA segments >= 2 KiB (f32)


def _pick_batch_tile(B):
    # Up to 2-way batch split across TensorCores (v7x megacore).  The (b_tile, C)
    # output block needs b_tile % 8 == 0 when b_tile != B.
    if B % 2 == 0 and (B // 2) % 8 == 0:
        return B // 2
    return B


def _plan_hw(b_tile, C, HW, itemsize, forced_hw_tile=None):
    """Returns (hw_tile, n_hw, hw_pad)."""
    if forced_hw_tile is not None:
        if forced_hw_tile >= HW:
            return HW, 1, HW
        assert forced_hw_tile % 128 == 0, "forced hw_tile must be lane-aligned"
        n_hw = _cdiv(HW, forced_hw_tile)
        return forced_hw_tile, n_hw, n_hw * forced_hw_tile

    row_bytes = b_tile * C * itemsize
    max_lanes = max(_X_BUF_BYTES // max(row_bytes, 1), 128)
    if HW <= max_lanes:
        return HW, 1, HW                       # single shot, no padding needed
    hw_tile = min(_MAX_HW_TILE, max(_MIN_HW_TILE, _round_down(max_lanes, 128)))
    n_hw = _cdiv(HW, hw_tile)
    # Rebalance into equal lane-aligned tiles so zero padding stays < 128 lanes/tile.
    hw_tile = min(hw_tile, _round_up(_cdiv(HW, n_hw), 128))
    return hw_tile, n_hw, n_hw * hw_tile


def channel_attention(x, w1, w2, *, hw_tile=None):
    """x: (B, C, H, W); w1: (hidden, C) conv1 1x1 weight; w2: (C, hidden)."""
    B, C, H, W = x.shape
    HW = H * W
    hidden = w1.shape[0]
    itemsize = jnp.dtype(x.dtype).itemsize

    b_tile = _pick_batch_tile(B)
    n_b = B // b_tile
    tile, n_hw, hw_pad = _plan_hw(b_tile, C, HW, itemsize, forced_hw_tile=hw_tile)
    need_mask = hw_pad > HW

    x_flat = x.reshape(B, C, HW)
    if hw_pad > HW:
        # Zero padding is exact for the sum; the max branch masks the tail in-kernel.
        x_flat = jnp.pad(x_flat, ((0, 0), (0, 0), (0, hw_pad - HW)))

    kernel = functools.partial(
        channel_attention_kernel,
        inv_hw=1.0 / HW, hw_len=HW, hw_tile=tile,
        need_mask=need_mask, b_tile=b_tile)

    # VMEM accounting: double-buffered x tile + (tiny) weights/output + accumulators.
    x_block_bytes = b_tile * C * tile * itemsize
    w_bytes = 2 * hidden * C * jnp.dtype(w1.dtype).itemsize
    o_block_bytes = b_tile * C * itemsize
    acc_bytes = b_tile * C * (4 + itemsize)
    vmem_need = 2 * x_block_bytes + 2 * w_bytes + 2 * o_block_bytes + acc_bytes
    # Always set the scoped-VMEM limit (v5e default is only 16 MiB); floor at 32 MiB
    # which is safe on every generation, and never push toward v7x's 64 MiB ceiling.
    vmem_limit = int(max(vmem_need + (4 << 20), 32 << 20))

    # Advisory cost estimate: this call is tiny and memory-bound.
    flops = 2 * B * C * HW + 2 * (2 * B) * C * hidden * 2
    bytes_accessed = (B * C * hw_pad + 2 * hidden * C + B * C) * itemsize
    cost = pl.CostEstimate(flops=flops, transcendentals=B * C,
                           bytes_accessed=bytes_accessed)

    out = pl.pallas_call(
        kernel,
        out_shape=jax.ShapeDtypeStruct((B, C), x.dtype),
        grid_spec=pltpu.PrefetchScalarGridSpec(
            num_scalar_prefetch=0,
            grid=(n_b, n_hw),
            in_specs=[
                pl.BlockSpec((b_tile, C, tile), lambda b, s: (b, 0, s)),
                pl.BlockSpec((hidden, C), lambda b, s: (0, 0)),
                pl.BlockSpec((C, hidden), lambda b, s: (0, 0)),
            ],
            out_specs=pl.BlockSpec((b_tile, C), lambda b, s: (b, 0)),
            scratch_shapes=[
                pltpu.VMEM((b_tile, C), jnp.float32),   # running spatial sum (f32)
                pltpu.VMEM((b_tile, C), x.dtype),       # running spatial max (native)
            ],
        ),
        compiler_params=pltpu.CompilerParams(
            dimension_semantics=("parallel", "arbitrary"),
            vmem_limit_bytes=vmem_limit),
        cost_estimate=cost,
    )(x_flat, w1, w2)
    return out.reshape(B, C, 1, 1)


def _ref_channel_attention(x, w1, w2):
    # Pure-JAX reference for sanity checking.
    xf = x.astype(jnp.float32)
    avg = jnp.mean(xf, axis=(2, 3))  # (B, C)
    mx = jnp.max(xf, axis=(2, 3))    # (B, C)

    def fc(z):
        h = jnp.maximum(z @ w1.T, 0.0)
        return h @ w2.T

    out = jax.nn.sigmoid(fc(avg) + fc(mx))
    return out[:, :, None, None].astype(x.dtype)


if __name__ == "__main__":
    key = jax.random.PRNGKey(0)
    kx, k1, k2, kx2, kx3, kx4 = jax.random.split(key, 6)

    # Module config as used in self_net's OCBlock(64, 64): in_planes=64, ratio=16.
    C, ratio = 64, 16
    hidden = C // ratio

    # Deterministic Kaiming-uniform-like init for the 1x1 conv weights
    # (conv1: (hidden, C, 1, 1), conv2: (C, hidden, 1, 1); trailing unit dims dropped
    # since a 1x1 conv on (B, C, 1, 1) is a plain matmul).
    bound1 = 1.0 / math.sqrt(C)
    bound2 = 1.0 / math.sqrt(hidden)
    w1 = jax.random.uniform(k1, (hidden, C), jnp.float32, -bound1, bound1)
    w2 = jax.random.uniform(k2, (C, hidden), jnp.float32, -bound2, bound2)

    def check(xx, msg, **kw):
        out = jax.block_until_ready(channel_attention(xx, w1, w2, **kw))
        ref = _ref_channel_attention(xx, w1, w2)
        assert out.shape == ref.shape, msg
        assert jnp.allclose(out, ref, atol=1e-5, rtol=1e-5), msg

    # 1) Small single-shot path (whole batch, single grid step, HW not lane-aligned).
    check(jax.random.normal(kx, (2, C, 8, 8), dtype=jnp.float32),
          "mismatch vs reference (single-shot path)")
    # 2) Tiled HW reduction path (multi-step spatial grid + VMEM accumulators).
    check(jax.random.normal(kx2, (2, C, 32, 32), dtype=jnp.float32),
          "mismatch vs reference (tiled path)", hw_tile=256)
    # 3) Ragged HW (13x13 = 169 lanes): zero padding + in-kernel tail mask for max.
    check(jax.random.normal(kx3, (2, C, 13, 13), dtype=jnp.float32),
          "mismatch vs reference (ragged/padded path)", hw_tile=128)
    # 4) Batch split across the leading 'parallel' grid axis (megacore on v7x).
    check(jax.random.normal(kx4, (16, C, 8, 8), dtype=jnp.float32),
          "mismatch vs reference (batch-parallel path)")

    print("KERNEL_OK")
</pallas_src>

<mosaic_0001>
module attributes {stable_mosaic.version = 11 : i64} {
  func.func @channel_attention_kernel(%arg0: i32, %arg1: i32, %arg2: memref<2x64x64xf32, #tpu.memory_space<vmem>>, %arg3: memref<4x64xf32, #tpu.memory_space<vmem>>, %arg4: memref<64x4xf32, #tpu.memory_space<vmem>>, %arg5: memref<2x64xf32, #tpu.memory_space<vmem>>, %arg6: memref<2x64xf32, #tpu.memory_space<vmem>>, %arg7: memref<2x64xf32, #tpu.memory_space<vmem>>) attributes {dimension_semantics = [#tpu.dimension_semantics<parallel>, #tpu.dimension_semantics<arbitrary>], iteration_bounds = array<i64: 1, 1>, scalar_prefetch = 0 : i64, scratch_operands = 2 : i64, tpu.core_type = #tpu.core_type<tc>, window_params = [{transform_indices = @transform_0, window_bounds = array<i64: 2, 64, 64>}, {pipeline_mode = #tpu.pipeline_mode<synchronous>, transform_indices = @transform_1, window_bounds = array<i64: 4, 64>}, {pipeline_mode = #tpu.pipeline_mode<synchronous>, transform_indices = @transform_2, window_bounds = array<i64: 64, 4>}, {transform_indices = @transform_3, window_bounds = array<i64: 2, 64>}]} {
    %c0_i32 = arith.constant 0 : i32
    %0 = arith.cmpi eq, %arg1, %c0_i32 : i32
    %1 = arith.extui %0 : i1 to i32
    %c0_i32_0 = arith.constant 0 : i32
    %2 = arith.cmpi ne, %1, %c0_i32_0 : i32
    scf.if %2 {
      %cst_14 = arith.constant 0.000000e+00 : f32
      %15 = vector.broadcast %cst_14 : f32 to vector<2x64xf32>
      %c0_15 = arith.constant 0 : index
      %c0_16 = arith.constant 0 : index
      %16 = vector.load %arg6[%c0_15, %c0_16] : memref<2x64xf32, #tpu.memory_space<vmem>>, vector<2x64xf32>
      tpu.vector_store %arg6[%c0_15, %c0_16], %15 {strides = array<i32>} : memref<2x64xf32, #tpu.memory_space<vmem>>, vector<2x64xf32>,
      %cst_17 = arith.constant 0xFF800000 : f32
      %17 = vector.broadcast %cst_17 : f32 to vector<2x64xf32>
      %c0_18 = arith.constant 0 : index
      %c0_19 = arith.constant 0 : index
      %18 = vector.load %arg7[%c0_18, %c0_19] : memref<2x64xf32, #tpu.memory_space<vmem>>, vector<2x64xf32>
      tpu.vector_store %arg7[%c0_18, %c0_19], %17 {strides = array<i32>} : memref<2x64xf32, #tpu.memory_space<vmem>>, vector<2x64xf32>,
    } else {
    }
    %c0 = arith.constant 0 : index
    %c0_1 = arith.constant 0 : index
    %c0_2 = arith.constant 0 : index
    %3 = vector.load %arg2[%c0, %c0_1, %c0_2] : memref<2x64x64xf32, #tpu.memory_space<vmem>>, vector<2x64x64xf32>
    %c0_3 = arith.constant 0 : index
    %c0_4 = arith.constant 0 : index
    %4 = vector.load %arg6[%c0_3, %c0_4] : memref<2x64xf32, #tpu.memory_space<vmem>>, vector<2x64xf32>
    %cst = arith.constant dense<0.000000e+00> : vector<2x64xf32>
    %5 = vector.multi_reduction <add>, %3, %cst [2] : vector<2x64x64xf32> to vector<2x64xf32>
    %6 = arith.addf %4, %5 : vector<2x64xf32>
    %c0_5 = arith.constant 0 : index
    %c0_6 = arith.constant 0 : index
    %7 = vector.load %arg6[%c0_5, %c0_6] : memref<2x64xf32, #tpu.memory_space<vmem>>, vector<2x64xf32>
    tpu.vector_store %arg6[%c0_5, %c0_6], %6 {strides = array<i32>} : memref<2x64xf32, #tpu.memory_space<vmem>>, vector<2x64xf32>,
    %c0_7 = arith.constant 0 : index
    %c0_8 = arith.constant 0 : index
    %8 = vector.load %arg7[%c0_7, %c0_8] : memref<2x64xf32, #tpu.memory_space<vmem>>, vector<2x64xf32>
    %cst_9 = arith.constant dense<0xFF800000> : vector<2x64xf32>
    %9 = vector.multi_reduction <maximumf>, %3, %cst_9 [2] : vector<2x64x64xf32> to vector<2x64xf32>
    %10 = arith.maximumf %8, %9 : vector<2x64xf32>
    %c0_10 = arith.constant 0 : index
    %c0_11 = arith.constant 0 : index
    %11 = vector.load %arg7[%c0_10, %c0_11] : memref<2x64xf32, #tpu.memory_space<vmem>>, vector<2x64xf32>
    tpu.vector_store %arg7[%c0_10, %c0_11], %10 {strides = array<i32>} : memref<2x64xf32, #tpu.memory_space<vmem>>, vector<2x64xf32>,
    %c0_i32_12 = arith.constant 0 : i32
    %12 = arith.cmpi eq, %arg1, %c0_i32_12 : i32
    %13 = arith.extui %12 : i1 to i32
    %c0_i32_13 = arith.constant 0 : i32
    %14 = arith.cmpi ne, %13, %c0_i32_13 : i32
    scf.if %14 {
      %c0_14 = arith.constant 0 : index
      %c0_15 = arith.constant 0 : index
      %15 = vector.load %arg6[%c0_14, %c0_15] : memref<2x64xf32, #tpu.memory_space<vmem>>, vector<2x64xf32>
      %cst_16 = arith.constant 1.562500e-02 : f32
      %16 = vector.broadcast %cst_16 : f32 to vector<2x64xf32>
      %17 = arith.mulf %15, %16 : vector<2x64xf32>
      %c0_17 = arith.constant 0 : index
      %c0_18 = arith.constant 0 : index
      %18 = vector.load %arg7[%c0_17, %c0_18] : memref<2x64xf32, #tpu.memory_space<vmem>>, vector<2x64xf32>
      %19 = tpu.concatenate %17, %18 in 0 : vector<2x64xf32>, vector<2x64xf32> -> vector<4x64xf32>
      %c0_19 = arith.constant 0 : index
      %c0_20 = arith.constant 0 : index
      %20 = vector.load %arg3[%c0_19, %c0_20] : memref<4x64xf32, #tpu.memory_space<vmem>>, vector<4x64xf32>
      %c0_21 = arith.constant 0 : index
      %c0_22 = arith.constant 0 : index
      %21 = vector.load %arg4[%c0_21, %c0_22] : memref<64x4xf32, #tpu.memory_space<vmem>>, vector<64x4xf32>
      %cst_23 = arith.constant dense<0.000000e+00> : vector<4x4xf32>
      %22 = tpu.matmul %19, %20, %cst_23 {dimension_numbers = #tpu.dot_dimension_numbers<[1], [1], [0], [0], [0, 0, 1, 0], [], []>} : vector<4x64xf32>, vector<4x64xf32>, vector<4x4xf32> -> vector<4x4xf32>
      %cst_24 = arith.constant 0.000000e+00 : f32
      %23 = vector.broadcast %cst_24 : f32 to vector<4x4xf32>
      %24 = arith.maximumf %22, %23 : vector<4x4xf32>
      %cst_25 = arith.constant dense<0.000000e+00> : vector<4x64xf32>
      %25 = tpu.matmul %24, %21, %cst_25 {dimension_numbers = #tpu.dot_dimension_numbers<[1], [1], [0], [0], [0, 0, 1, 0], [], []>} : vector<4x4xf32>, vector<64x4xf32>, vector<4x64xf32> -> vector<4x64xf32>
      %26 = vector.extract_strided_slice %25 {offsets = [0, 0], sizes = [2, 64], strides = [1, 1]} : vector<4x64xf32> to vector<2x64xf32>
      %27 = vector.extract_strided_slice %25 {offsets = [2, 0], sizes = [2, 64], strides = [1, 1]} : vector<4x64xf32> to vector<2x64xf32>
      %28 = arith.addf %26, %27 : vector<2x64xf32>
      %29 = arith.negf %28 : vector<2x64xf32>
      %30 = math.exp %29 : vector<2x64xf32>
      %cst_26 = arith.constant 1.000000e+00 : f32
      %31 = vector.broadcast %cst_26 : f32 to vector<2x64xf32>
      %32 = arith.addf %31, %30 : vector<2x64xf32>
      %33 = arith.divf %31, %32 : vector<2x64xf32>
      %c0_27 = arith.constant 0 : index
      %c0_28 = arith.constant 0 : index
      %34 = vector.load %arg5[%c0_27, %c0_28] : memref<2x64xf32, #tpu.memory_space<vmem>>, vector<2x64xf32>
      tpu.vector_store %arg5[%c0_27, %c0_28], %33 {strides = array<i32>} : memref<2x64xf32, #tpu.memory_space<vmem>>, vector<2x64xf32>,
    } else {
    }
    return
  }
  func.func @transform_0(%arg0: i32, %arg1: i32) -> (i32, i32, i32) {
    %c0_i32 = arith.constant 0 : i32
    %c0_i32_0 = arith.constant 0 : i32
    return %arg0, %c0_i32, %arg1 : i32, i32, i32
  }
  func.func @transform_1(%arg0: i32, %arg1: i32) -> (i32, i32) {
    %c0_i32 = arith.constant 0 : i32
    %c0_i32_0 = arith.constant 0 : i32
    %c0_i32_1 = arith.constant 0 : i32
    return %c0_i32, %c0_i32_0 : i32, i32
  }
  func.func @transform_2(%arg0: i32, %arg1: i32) -> (i32, i32) {
    %c0_i32 = arith.constant 0 : i32
    %c0_i32_0 = arith.constant 0 : i32
    %c0_i32_1 = arith.constant 0 : i32
    return %c0_i32, %c0_i32_0 : i32, i32
  }
  func.func @transform_3(%arg0: i32, %arg1: i32) -> (i32, i32) {
    %c0_i32 = arith.constant 0 : i32
    %c0_i32_0 = arith.constant 0 : i32
    return %arg0, %c0_i32 : i32, i32
  }
}

</mosaic_0001>

<bundles_post_ra>
// kernel: tpu_custom_call.1
= control target key start
LH: loop header
LB: loop body
LE: loop exit
PB: predicated region body
PF: predicated region fallthrough
CT: control target
= control target key end

     0   :  { %8 = vsyncpa [#allocation5], 0  ;;  %s974_s0 = inlined_call_operand.hbm [shape: f32[2,64,64], index: 0, kind: input, shape index: {}]   ;;  %s975_s1 = inlined_call_operand.vmem [shape: f32[4,64], index: 1, kind: input, shape index: {}]   ;;  %s976_s2 = inlined_call_operand.vmem [shape: f32[64,4], index: 2, kind: input, shape index: {}]   ;;  %s977_s3 = inlined_call_operand.hbm [shape: f32[2,64], index: 3, kind: output, shape index: {}]  }
   0x1   :  { %9 = vsyncpa [#allocation6], 0  ;;  %s709_s12 = smov [#allocation4]   ;;  %s661_s16 = scalar_lea.hbm %s974_s0, 2048 }
   0x2   :  { %s15_s13 = sshll.u32 %s709_s12, 4  ;;  %p662_p0 = scmp.ne.s32.totalorder %s974_s0, %s661_s16  ;;  %s16_s13 = int_to_ptr.vmem [resolvable:$true] %s15_s13 }
   0x3   :  { %p665_p1 = scmp.lt.u32.totalorder %s661_s16, %s974_s0 }
   0x5   :  { %p667_p2 = pnand %p665_p1, %p662_p0 }
   0x7   :  { %670 = shalt.err (!%p667_p2)
}
   0x8   :  { %s671_s21 = scalar_lea.vmem %s16_s13, 2048  ;;  %p676_p4 = scmp.lt.s32.totalorder %s16_s13, %s16_s13 }
   0x9   :  { %p672_p3 = scmp.ne.s32.totalorder %s16_s13, %s671_s21  ;;  %p677_p5 = scmp.lt.s32.totalorder %s671_s21, %s671_s21 }
   0xb   :  { %p678_p6 = por %p677_p5, %p676_p4 }
   0xd   :  { %p679_p7 = pnand %p678_p6, %p672_p3 }
   0xf   :  { %682 = shalt.err (!%p679_p7)
}
  0x10   :  { %s710_s22 = smov 128   ;;  %s711_s23 = smov 8  }
  0x11   :  { %21 = dma.hbm_to_vmem [thread:$0]  %s974_s0, 2048, %s16_s13, [#allocation5], %s710_s22, %s710_s22, %s711_s23  }
  0x12   :  { %705 = dma.done.wait [#allocation5], 2048  }
  0x13   :  { %706 = vsyncadd [#allocation5], 4294965248  ;;  %vm53_vm0 = vcmask 523264   ;;  %v44_v0 = vld [vmem:[#allocation4 + $0x40] sm:$0xff]  ;;  %v45_v2 = vld [vmem:[#allocation4 + $0x48] sm:$0xff]  ;;  %vm33_vm1 = vcmask 517120  }
  0x14   :  { %v36_v1 = vld [vmem:[#allocation4] sm:$0xff]  ;;  %v78_v3 = vsel %vm53_vm0, %v44_v0, 0.0  ;;  %v37_v5 = vld [vmem:[#allocation4 + $0x8] sm:$0xff]  ;;  %v81_v6 = vsel %vm53_vm0, %v45_v2, 0.0  ;;  %v246_v10 = vsel %vm53_vm0, %v45_v2, -inf  ;;  %v243_v11 = vsel %vm53_vm0, %v44_v0, -inf }
  0x15   :  { %v54_v4 = vsel %vm53_vm0, %v36_v1, 0.0  ;;  %79 = vadd.xlane.f32.xlu1 %v78_v3  ;;  %v57_v7 = vsel %vm53_vm0, %v37_v5, 0.0  ;;  %v222_v8 = vsel %vm53_vm0, %v37_v5, -inf  ;;  %v219_v9 = vsel %vm53_vm0, %v36_v1, -inf  ;;  %v46_v12 = vld [vmem:[#allocation4 + $0x50] sm:$0xff]  ;;  %v47_v18 = vld [vmem:[#allocation4 + $0x58] sm:$0xff] }
  0x16   :  { %55 = vadd.xlane.f32.xlu0 %v54_v4  ;;  %v38_v13 = vld [vmem:[#allocation4 + $0x10] sm:$0xff]  ;;  %v84_v14 = vsel %vm53_vm0, %v46_v12, 0.0  ;;  %v249_v16 = vsel %vm53_vm0, %v46_v12, -inf  ;;  %v39_v19 = vld [vmem:[#allocation4 + $0x18] sm:$0xff]  ;;  %v87_v20 = vsel %vm53_vm0, %v47_v18, 0.0  ;;  %v252_v22 = vsel %vm53_vm0, %v47_v18, -inf }
  0x17   :  { %v60_v15 = vsel %vm53_vm0, %v38_v13, 0.0  ;;  %v225_v17 = vsel %vm53_vm0, %v38_v13, -inf  ;;  %v63_v21 = vsel %vm53_vm0, %v39_v19, 0.0  ;;  %v228_v23 = vsel %vm53_vm0, %v39_v19, -inf  ;;  %v48_v24 = vld [vmem:[#allocation4 + $0x60] sm:$0xff]  ;;  %v49_v30 = vld [vmem:[#allocation4 + $0x68] sm:$0xff] }
  0x18   :  { %v40_v25 = vld [vmem:[#allocation4 + $0x20] sm:$0xff]  ;;  %v90_v26 = vsel %vm53_vm0, %v48_v24, 0.0  ;;  %v255_v28 = vsel %vm53_vm0, %v48_v24, -inf  ;;  %v41_v31 = vld [vmem:[#allocation4 + $0x28] sm:$0xff]  ;;  %v93_v32 = vsel %vm53_vm0, %v49_v30, 0.0  ;;  %v258_v34 = vsel %vm53_vm0, %v49_v30, -inf }
  0x19   :  { %82 = vadd.xlane.f32.xlu1 %v81_v6  ;;  %v66_v27 = vsel %vm53_vm0, %v40_v25, 0.0  ;;  %v231_v29 = vsel %vm53_vm0, %v40_v25, -inf  ;;  %v69_v33 = vsel %vm53_vm0, %v41_v31, 0.0  ;;  %v234_v35 = vsel %vm53_vm0, %v41_v31, -inf  ;;  %v50_v36 = vld [vmem:[#allocation4 + $0x70] sm:$0xff]  ;;  %v51_v42 = vld [vmem:[#allocation4 + $0x78] sm:$0xff] }
  0x1a   :  { %58 = vadd.xlane.f32.xlu0 %v57_v7  ;;  %v42_v37 = vld [vmem:[#allocation4 + $0x30] sm:$0xff]  ;;  %v96_v38 = vsel %vm53_vm0, %v50_v36, 0.0  ;;  %v261_v40 = vsel %vm53_vm0, %v50_v36, -inf  ;;  %v43_v43 = vld [vmem:[#allocation4 + $0x38] sm:$0xff]  ;;  %v99_v44 = vsel %vm53_vm0, %v51_v42, 0.0  ;;  %v264_v46 = vsel %vm53_vm0, %v51_v42, -inf }
  0x1b   :  { %v72_v39 = vsel %vm53_vm0, %v42_v37, 0.0  ;;  %v237_v41 = vsel %vm53_vm0, %v42_v37, -inf  ;;  %v75_v45 = vsel %vm53_vm0, %v43_v43, 0.0  ;;  %v240_v47 = vsel %vm53_vm0, %v43_v43, -inf  ;;  %v376_v50 = vld [vmem:[%s975_s1] sm:$0xf] }
  0x1c   :  { %v712_v48 = vmov 0.0   ;;  %v713_v49 = vmov -inf   ;;  %vm714_vm2 = vmmov 0   ;;  %v377_v51 = vld [vmem:[%s976_s2] sm:$0xff]  ;;  %v378_v52 = vld [vmem:[%s976_s2 + $0x8] sm:$0xff]  ;;  %vm462_vm3 = vcmask 31744  }
  0x1d   :  { %223 = vmax.xlane.f32.xlu1 %v222_v8  ;;  %34 = vst.msk [vmem:[#allocation2] sm:$0x3] %vm33_vm1, %v712_v48  ;;  %609 = vmatprep.subr.mxu0 %v712_v48  ;;  %35 = vst.msk [vmem:[#allocation3] sm:$0x3] %vm33_vm1, %v713_v49  ;;  %v715_v53 = vmov 0.0|0.0   ;;  %v634_v54 = vpack.c.bf16 %v378_v52, %v377_v51  ;;  %v379_v56 = vld [vmem:[%s976_s2 + $0x10] sm:$0xff] }
  0x1e   :  { %220 = vmax.xlane.f32.xlu0 %v219_v9  ;;  %610 = vmatpush3.xpose.msk.msra.mxu0 %vm53_vm0, %v376_v50  ;;  %vm795_vm4 = vmpackc.low %vm462_vm3, %vm462_vm3  ;;  %v380_v57 = vld [vmem:[%s976_s2 + $0x18] sm:$0xff]  ;;  %v381_v59 = vld [vmem:[%s976_s2 + $0x20] sm:$0xff]  ;;  %vm129_vm5 = vcmask 130112   ;;  %vm136_vm6 = vcmask 195712   ;;  %vm143_vm7 = vcmask 261312   ;;  %vm150_vm8 = vcmask 326912  }
  0x1f   :  { %611 = vmatprep.mubr.msk.f32.mxu0 %vm714_vm2, %v712_v48  ;;  %630 = vmatprep.mubr.msk.f32.mxu1 %vm714_vm2, %v712_v48  ;;  %v638_v58 = vpack.c.bf16 %v380_v57, %v379_v56  ;;  %v382_v60 = vld [vmem:[%s976_s2 + $0x28] sm:$0xff]  ;;  %v383_v62 = vld [vmem:[%s976_s2 + $0x30] sm:$0xff]  ;;  %v384_v63 = vld [vmem:[%s976_s2 + $0x38] sm:$0xff]  ;;  %vm157_vm9 = vcmask 392512   ;;  %vm164_vm10 = vcmask 458112   ;;  %vm171_vm11 = vcmask 523712  }
  0x20   :  { %633 = vmatprep.subr.bf16.mxu1 %v715_v53  ;;  %v642_v61 = vpack.c.bf16 %v382_v60, %v381_v59  ;;  %v646_v0 = vpack.c.bf16 %v384_v63, %v383_v62  ;;  %vm212_vm12 = vcmask 1041409   ;;  %vm374_vm13 = vcmask 1041408   ;;  %s716_s2 = smov [#allocation7]  }
  0x21   :  { %247 = vmax.xlane.f32.xlu1 %v246_v10  ;;  %636 = vmatpush3.bf16.xpose.msk.msra.mxu1 %vm795_vm4, %v634_v54  ;;  %s577_s15 = sshll.u32 %s716_s2, 4  ;;  %s578_s15 = int_to_ptr.vmem [resolvable:$true] %s577_s15 }
  0x22   :  { %244 = vmax.xlane.f32.xlu0 %v243_v11  ;;  %637 = vmatprep.subr.bf16.mxu1 %v715_v53  ;;  %s683_s16 = scalar_lea.vmem %s578_s15, 32  ;;  %p688_p9 = scmp.lt.s32.totalorder %s578_s15, %s578_s15 }
  0x23   :  { %p684_p8 = scmp.ne.s32.totalorder %s578_s15, %s683_s16  ;;  %p689_p10 = scmp.lt.s32.totalorder %s683_s16, %s683_s16 }
  0x25   :  { %85 = vadd.xlane.f32.xlu1 %v84_v14  ;;  %p690_p11 = por %p689_p10, %p688_p9 }
  0x26   :  { %61 = vadd.xlane.f32.xlu0 %v60_v15 }
  0x27   :  { %p691_p12 = pnand %p690_p11, %p684_p8 }
  0x29   :  { %250 = vmax.xlane.f32.xlu1 %v249_v16  ;;  %640 = vmatpush3.bf16.xpose.msk.msra.mxu1 %vm795_vm4, %v638_v58 }
  0x2a   :  { %226 = vmax.xlane.f32.xlu0 %v225_v17  ;;  %641 = vmatprep.subr.bf16.mxu1 %v715_v53  ;;  %v118_v17 = vlaneseq }
  0x2c   :  { %v121_v24 = vshrl.u32 %v118_v17, 7 }
  0x2d   :  { %88 = vadd.xlane.f32.xlu1 %v87_v20  ;;  %v119_v20 = vand.u32 127, %v118_v17 }
  0x2e   :  { %64 = vadd.xlane.f32.xlu0 %v63_v21 }
  0x2f   :  { %v131_v25 = vadd.s32 4294967280, %v119_v20  ;;  %v152_v31 = vadd.s32 4294967256, %v119_v20 }
  0x31   :  { %253 = vmax.xlane.f32.xlu1 %v252_v22  ;;  %644 = vmatpush3.bf16.xpose.msk.msra.mxu1 %vm795_vm4, %v642_v61 }
  0x32   :  { %229 = vmax.xlane.f32.xlu0 %v228_v23  ;;  %645 = vmatprep.subr.bf16.mxu1 %v715_v53  ;;  %v124_v23 = vadd.s32 4294967288, %v119_v20 }
  0x34   :  { %v127_v30 = vsub.s32 %v124_v23, %v121_v24 }
  0x35   :  { %91 = vadd.xlane.f32.xlu1 %v90_v26 }
  0x36   :  { %67 = vadd.xlane.f32.xlu0 %v66_v27 }
  0x39   :  { %256 = vmax.xlane.f32.xlu1 %v255_v28  ;;  %648 = vmatpush3.bf16.xpose.msk.msra.mxu1 %vm795_vm4, %v646_v0  ;;  %v138_v28 = vadd.s32 4294967272, %v119_v20 }
  0x3a   :  { %232 = vmax.xlane.f32.xlu0 %v231_v29  ;;  %v145_v29 = vadd.s32 4294967264, %v119_v20 }
  0x3d   :  { %94 = vadd.xlane.f32.xlu1 %v93_v32  ;;  %v159_v32 = vadd.s32 4294967248, %v119_v20 }
  0x3e   :  { %70 = vadd.xlane.f32.xlu0 %v69_v33  ;;  %v166_v33 = vadd.s32 4294967240, %v119_v20 }
  0x3f   :  { %v880_v42 = vsub.s32 %v159_v32, %v121_v24  ;;  %v52_v32 = vld [vmem:[#allocation2] sm:$0x3] }
  0x41   :  { %259 = vmax.xlane.f32.xlu1 %v258_v34  ;;  %v122_v34 = vsub.s32 %v119_v20, %v121_v24 }
  0x42   :  { %235 = vmax.xlane.f32.xlu0 %v234_v35  ;;  %v134_v35 = vsub.s32 %v131_v25, %v121_v24 }
  0x45   :  { %97 = vadd.xlane.f32.xlu1 %v96_v38  ;;  %v873_v38 = vsub.s32 %v138_v28, %v121_v24 }
  0x46   :  { %73 = vadd.xlane.f32.xlu0 %v72_v39  ;;  %v875_v39 = vsub.s32 %v145_v29, %v121_v24 }
  0x49   :  { %262 = vmax.xlane.f32.xlu1 %v261_v40 }
  0x4a   :  { %238 = vmax.xlane.f32.xlu0 %v237_v41  ;;  %v878_v41 = vsub.s32 %v152_v31, %v121_v24 }
  0x4d   :  { %100 = vadd.xlane.f32.xlu1 %v99_v44 }
  0x4e   :  { %76 = vadd.xlane.f32.xlu0 %v75_v45 }
  0x51   :  { %265 = vmax.xlane.f32.xlu1 %v264_v46  ;;  %v885_v46 = vsub.s32 %v166_v33, %v121_v24 }
  0x52   :  { %241 = vmax.xlane.f32.xlu0 %v240_v47 }
  0xa2   :  { %v825_v1 = vpop.xlane.xlu1 %79 }
  0xa3   :  { %v827_v2 = vpop.xlane.xlu0 %55  ;;  %v176_v47 = vrot.slane %v825_v1, %v122_v34 }
  0xa4   :  { %v123_v53 = vrot.slane %v827_v2, %v122_v34 }
  0xa6   :  { %v829_v3 = vpop.xlane.xlu1 %82 }
  0xa7   :  { %v831_v4 = vpop.xlane.xlu0 %58  ;;  %v180_v40 = vrot.slane %v829_v3, %v127_v30 }
  0xa8   :  { %v128_v43 = vrot.slane %v831_v4, %v127_v30 }
  0xa9   :  { %v181_v57 = vsel %vm129_vm5, %v180_v40, %v176_v47 }
  0xaa   :  { %v833_v5 = vpop.xlane.xlu1 %223  ;;  %v130_v60 = vsel %vm129_vm5, %v128_v43, %v123_v53 }
  0xab   :  { %v835_v6 = vpop.xlane.xlu0 %220  ;;  %v290_v44 = vrot.slane %v833_v5, %v127_v30 }
  0xac   :  { %v286_v45 = vrot.slane %v835_v6, %v122_v34 }
  0xae   :  { %v837_v7 = vpop.xlane.xlu1 %247  ;;  %v291_v61 = vsel %vm129_vm5, %v290_v44, %v286_v45 }
  0xaf   :  { %v839_v8 = vpop.xlane.xlu0 %244  ;;  %v329_v48 = vrot.slane %v837_v7, %v127_v30 }
  0xb0   :  { %v325_v49 = vrot.slane %v839_v8, %v122_v34 }
  0xb2   :  { %v841_v9 = vpop.xlane.xlu1 %85  ;;  %v330_v0 = vsel %vm129_vm5, %v329_v48, %v325_v49  ;;  %v218_v49 = vld [vmem:[#allocation3] sm:$0x3] }
  0xb3   :  { %v843_v10 = vpop.xlane.xlu0 %61  ;;  %v185_v50 = vrot.slane %v841_v9, %v134_v35 }
  0xb4   :  { %v135_v54 = vrot.slane %v843_v10, %v134_v35 }
  0xb5   :  { %v186_v1 = vsel %vm136_vm6, %v185_v50, %v181_v57 }
  0xb6   :  { %v845_v11 = vpop.xlane.xlu1 %250  ;;  %v137_v6 = vsel %vm136_vm6, %v135_v54, %v130_v60 }
  0xb7   :  { %v847_v12 = vpop.xlane.xlu0 %226  ;;  %v334_v55 = vrot.slane %v845_v11, %v134_v35 }
  0xb8   :  { %v295_v56 = vrot.slane %v847_v12, %v134_v35 }
  0xb9   :  { %v335_v7 = vsel %vm136_vm6, %v334_v55, %v330_v0 }
  0xba   :  { %v849_v13 = vpop.xlane.xlu1 %88  ;;  %v296_v8 = vsel %vm136_vm6, %v295_v56, %v291_v61 }
  0xbb   :  { %v851_v14 = vpop.xlane.xlu0 %64  ;;  %v190_v58 = vrot.slane %v849_v13, %v873_v38 }
  0xbc   :  { %v142_v59 = vrot.slane %v851_v14, %v873_v38 }
  0xbd   :  { %v191_v10 = vsel %vm143_vm7, %v190_v58, %v186_v1 }
  0xbe   :  { %v853_v15 = vpop.xlane.xlu1 %253  ;;  %v144_v11 = vsel %vm143_vm7, %v142_v59, %v137_v6 }
  0xbf   :  { %v855_v16 = vpop.xlane.xlu0 %229  ;;  %v339_v62 = vrot.slane %v853_v15, %v873_v38 }
  0xc0   :  { %v300_v15 = vrot.slane %v855_v16, %v873_v38 }
  0xc1   :  { %v340_v14 = vsel %vm143_vm7, %v339_v62, %v335_v7 }
  0xc2   :  { %v857_v18 = vpop.xlane.xlu1 %91  ;;  %v301_v33 = vsel %vm143_vm7, %v300_v15, %v296_v8 }
  0xc3   :  { %v859_v19 = vpop.xlane.xlu0 %67  ;;  %v195_v63 = vrot.slane %v857_v18, %v875_v39 }
  0xc4   :  { %v149_v2 = vrot.slane %v859_v19, %v875_v39 }
  0xc5   :  { %v196_v17 = vsel %vm150_vm8, %v195_v63, %v191_v10 }
  0xc6   :  { %v861_v21 = vpop.xlane.xlu1 %256  ;;  %v151_v19 = vsel %vm150_vm8, %v149_v2, %v144_v11 }
  0xc7   :  { %v863_v22 = vpop.xlane.xlu0 %232  ;;  %v344_v18 = vrot.slane %v861_v21, %v875_v39 }
  0xc8   :  { %v305_v20 = vrot.slane %v863_v22, %v875_v39 }
  0xc9   :  { %v345_v34 = vsel %vm150_vm8, %v344_v18, %v340_v14 }
  0xca   :  { %v865_v26 = vpop.xlane.xlu1 %94 }
  0xcb   :  { %v867_v27 = vpop.xlane.xlu0 %70  ;;  %v200_v3 = vrot.slane %v865_v26, %v878_v41 }
  0xcc   :  { %v156_v9 = vrot.slane %v867_v27, %v878_v41 }
  0xcd   :  { %v201_v23 = vsel %vm157_vm9, %v200_v3, %v196_v17 }
  0xce   :  { %v869_v36 = vpop.xlane.xlu1 %259  ;;  %v158_v27 = vsel %vm157_vm9, %v156_v9, %v151_v19 }
  0xcf   :  { %v871_v37 = vpop.xlane.xlu0 %235  ;;  %v349_v24 = vrot.slane %v869_v36, %v878_v41 }
  0xd0   :  { %v310_v16 = vrot.slane %v871_v37, %v878_v41  ;;  %v306_v37 = vsel %vm150_vm8, %v305_v20, %v301_v33 }
  0xd1   :  { %v350_v38 = vsel %vm157_vm9, %v349_v24, %v345_v34 }
  0xd2   :  { %v98_v51 = vpop.xlane.xlu1 %97  ;;  %v311_v43 = vsel %vm157_vm9, %v310_v16, %v306_v37 }
  0xd3   :  { %v74_v52 = vpop.xlane.xlu0 %73  ;;  %v205_v12 = vrot.slane %v98_v51, %v880_v42 }
  0xd4   :  { %v163_v13 = vrot.slane %v74_v52, %v880_v42 }
  0xd5   :  { %v206_v29 = vsel %vm164_vm10, %v205_v12, %v201_v23 }
  0xd6   :  { %v263_v4 = vpop.xlane.xlu1 %262  ;;  %v165_v22 = vsel %vm164_vm10, %v163_v13, %v158_v27 }
  0xd7   :  { %v239_v5 = vpop.xlane.xlu0 %238  ;;  %v354_v30 = vrot.slane %v263_v4, %v880_v42 }
  0xd8   :  { %v315_v31 = vrot.slane %v239_v5, %v880_v42 }
  0xd9   :  { %v355_v47 = vsel %vm164_vm10, %v354_v30, %v350_v38 }
  0xda   :  { %v101_v25 = vpop.xlane.xlu1 %100  ;;  %v316_v48 = vsel %vm164_vm10, %v315_v31, %v311_v43 }
  0xdb   :  { %v77_v26 = vpop.xlane.xlu0 %76  ;;  %v210_v28 = vrot.slane %v101_v25, %v885_v46 }
  0xdc   :  { %v170_v21 = vrot.slane %v77_v26, %v885_v46 }
  0xdd   :  { %v211_v35 = vsel %vm171_vm11, %v210_v28, %v206_v29 }
  0xde   :  { %v172_v36 = vsel %vm171_vm11, %v170_v21, %v165_v22  ;;  %v266_v40 = vpop.xlane.xlu1 %265 }
  0xdf   :  { %v213_v39 = vsel %vm212_vm12, %v211_v35, %v172_v36  ;;  %v242_v41 = vpop.xlane.xlu0 %241  ;;  %v359_v42 = vrot.slane %v266_v40, %v885_v46 }
  0xe0   :  { %v320_v44 = vrot.slane %v242_v41, %v885_v46  ;;  %v215_v45 = vadd.f32 %v213_v39, %v52_v32 }
  0xe1   :  { %v360_v50 = vsel %vm171_vm11, %v359_v42, %v355_v47 }
  0xe2   :  { %v321_v51 = vsel %vm171_vm11, %v320_v44, %v316_v48  ;;  %217 = vst.msk [vmem:[#allocation2] sm:$0x3] %vm33_vm1, %v215_v45 }
  0xe3   :  { %v361_v52 = vsel %vm212_vm12, %v360_v50, %v321_v51 }
  0xe4   :  { %v363_v53 = vmax.f32 %v218_v49, %v361_v52 }
  0xe6   :  { %364 = vst.msk [vmem:[#allocation3] sm:$0x3] %vm33_vm1, %v363_v53 }
  0xe9   :  { %v368_v54 = vld [vmem:[#allocation2] sm:$0x3] }
  0xea   :  { %v369_v46 = vmul.f32 0.015625, %v368_v54 }
  0xed   :  { %v370_v55 = vld [vmem:[#allocation3] sm:$0x3] }
  0xee   :  { %v372_v56 = vrot.slane %v370_v55, 6 }
  0xf0   :  { %v375_v57 = vsel %vm374_vm13, %v369_v46, %v372_v56 }
  0xf1   :  { %612 = vmatmul.mubr.msk.f32.vlgmr.msra.gmra.mrb[0].mxu0 %vm53_vm0, %v375_v57 }
 0x1c4   :  { %v457_v58 = vpop.f32.mrb[0].mxu0 }
 0x1c5   :  { %v461_v59 = vmax.f32 %v457_v58, 0.0  ;;  %v613_v60 = vpop.f32.mrb[1].mxu0 }
 0x1c7   :  { %631 = vmatmul.mubr.msk.f32.vlgmr.msra.gmra.mrb[0].mxu1 %vm462_vm3, %v461_v59 }
 0x29a   :  { %v556_v61 = vpop.f32.mrb[0].mxu1 }
 0x29b   :  { %v561_v62 = vrot.slane %v556_v61, 2  ;;  %v632_v63 = vpop.f32.mrb[1].mxu1 }
 0x29d   :  { %v563_v0 = vadd.f32 %v561_v62, %v556_v61 }
 0x29f   :  { %v597_v1 = vmul.f32 -1.442695, %v563_v0 }
 0x2a1   :  { %657 = vpow2.f32 %v597_v1 }
 0x2ab   :  { %v658_v2 = vpop.eup %657 }
 0x2ac   :  { %v567_v3 = vadd.f32 1.0, %v658_v2 }
 0x2ae   :  { %659 = vrcp.f32 %v567_v3 }
 0x2b8   :  { %v660_v4 = vpop.eup %659 }
 0x2b9   :  { %570 = vst.msk [vmem:[#allocation7] sm:$0x3] %vm33_vm1, %v660_v4 }
 0x2ba   :  { %694 = shalt.err (!%p691_p12)
}
 0x2bb   :  { %s695_s19 = scalar_lea.hbm %s977_s3, 32 }
 0x2bc   :  { %p696_p13 = scmp.ne.s32.totalorder %s977_s3, %s695_s19  ;;  %p699_p0 = scmp.lt.u32.totalorder %s695_s19, %s977_s3 }
 0x2be   :  { %p701_p1 = pnand %p699_p0, %p696_p13 }
 0x2c0   :  { %704 = shalt.err (!%p701_p1)
}
 0x2c1   :  { %580 = dma.vmem_to_hbm [thread:$0]  %s578_s15, 32, %s977_s3, [#allocation6]  }
 0x2c2   :  { %707 = dma.done.wait [#allocation6], 32  }
 0x2c3   :  { %708 = vsyncadd [#allocation6], 4294967264 }
 0x2c4   :  { %584 = vsyncpa [#allocation5], 1 }
 0x2c5   :  { %585 = vsyncpa [#allocation6], 1 }

</bundles_post_ra>
